<compile_context>
chip_gen: v7x
topology: tpu7x:2x2x1
jax: 0.10.0
libtpu: 0.0.40
codegen_flags: <defaults>
</compile_context>

<pallas_src>
import math
from functools import partial

import jax
import jax.numpy as jnp
from jax.experimental import pallas as pl
from jax.experimental.pallas import tpu as pltpu


def _round_up(x, m):
    return ((x + m - 1) // m) * m


def _physical_vmem_bytes():
    try:
        return int(pltpu.get_tpu_info().vmem_capacity_bytes)
    except Exception:
        return 64 * 1024 * 1024  # conservative fallback (v7x per-TensorCore)


# ---------------------------------------------------------------------------
# Shared epilogue:
#   out = LeakyReLU((ego+side)@W1^T + b1) + LeakyReLU((ego*side)@W2^T + b2)
# Two-pass form keeps the peak live set low; maximum(h, 0.01*h) == LeakyReLU.
# ---------------------------------------------------------------------------
def _epilogue(ego_row, side, w1t_ref, b1_ref, w2t_ref, b2_ref, o_ref):
    slope = jnp.float32(0.01)  # nn.LeakyReLU default negative_slope
    h1 = jnp.dot(ego_row + side, w1t_ref[...],
                 preferred_element_type=jnp.float32) + b1_ref[...]
    o_ref[...] = jnp.maximum(h1, slope * h1).astype(o_ref.dtype)
    h2 = jnp.dot(ego_row * side, w2t_ref[...],
                 preferred_element_type=jnp.float32) + b2_ref[...]
    o_ref[...] += jnp.maximum(h2, slope * h2).astype(o_ref.dtype)


def _kernel_resident(a_ref, ego_ref, w1t_ref, b1_ref, w2t_ref, b2_ref,
                     o_ref, side_acc, *, tm, tk):
    # ego (f32) is fully VMEM-resident; sliced for both the SpMM rhs and the
    # epilogue row block -> A_in is the only large HBM stream.
    i = pl.program_id(0)
    k = pl.program_id(1)

    @pl.when(k == 0)
    def _():
        side_acc[...] = jnp.zeros_like(side_acc)

    rhs = ego_ref[pl.ds(pl.multiple_of(k * tk, tk), tk), :].astype(a_ref.dtype)
    side_acc[...] += jnp.dot(a_ref[...], rhs,
                             preferred_element_type=jnp.float32)

    @pl.when(k == pl.num_programs(1) - 1)
    def _():
        ego_row = ego_ref[pl.ds(pl.multiple_of(i * tm, tm), tm), :]
        _epilogue(ego_row, side_acc[...], w1t_ref, b1_ref, w2t_ref, b2_ref,
                  o_ref)


def _kernel_streamed(a_ref, ego_k_ref, ego_i_ref, w1t_ref, b1_ref, w2t_ref,
                     b2_ref, o_ref, side_acc):
    # Fallback for very large N where ego does not fit the VMEM budget.
    k = pl.program_id(1)

    @pl.when(k == 0)
    def _():
        side_acc[...] = jnp.zeros_like(side_acc)

    side_acc[...] += jnp.dot(a_ref[...], ego_k_ref[...].astype(a_ref.dtype),
                             preferred_element_type=jnp.float32)

    @pl.when(k == pl.num_programs(1) - 1)
    def _():
        _epilogue(ego_i_ref[...], side_acc[...], w1t_ref, b1_ref, w2t_ref,
                  b2_ref, o_ref)


@partial(jax.jit, static_argnames=("a_dtype",))
def aggregator_forward(ego_embeddings, a_in, params, *, a_dtype=jnp.bfloat16):
    """Bi-interaction Aggregator forward.

    ego_embeddings: (N, in_dim) f32
    a_in:           (N, N) dense adjacency (== densified torch.sparse A_in)
    params:         {"w1": (out_dim, in_dim), "b1": (out_dim,),
                     "w2": (out_dim, in_dim), "b2": (out_dim,)}
    a_dtype:        dtype for the A_in stream / SpMM operands (default bf16;
                    accumulation is always f32).
    """
    N, D = ego_embeddings.shape
    out_dim = params["w1"].shape[0]

    # --- static tiling decisions (lane-dense, minimal padding) -------------
    Dp = _round_up(max(D, 128), 128)
    Op = _round_up(max(out_dim, 128), 128)

    Np = _round_up(N, 128)
    Np512 = _round_up(N, 512)
    if Np512 * Np512 <= int(1.05 * Np * Np):  # <=5% extra A bytes for 512 tiles
        Np = Np512

    def _pick_tile(limit):
        for cand in (512, 384, 256, 128):
            if cand <= limit and Np % cand == 0:
                return cand
        return 128

    tk = _pick_tile(Np)                    # big A tiles -> near HBM roofline
    tm = _pick_tile(max(Np // 2, 128))     # keep >=2 row blocks (v7x: 2 TCs)

    # --- generation-aware VMEM budget & residency decision ------------------
    isz_a = jnp.dtype(a_dtype).itemsize
    phys_vmem = _physical_vmem_bytes()
    vmem_budget = min(phys_vmem * 3 // 4, 100 * 1024 * 1024)
    fixed_bytes = (2 * tm * tk * isz_a              # A tiles (double-buffered)
                   + 2 * tm * Op * 4                # output tiles
                   + 2 * 2 * (Dp * Op + Op) * 4     # W1^T/W2^T + biases
                   + tm * Dp * 4                    # side accumulator scratch
                   + 2 * 1024 * 1024)               # compiler scratch headroom
    resident_bytes = 2 * Np * Dp * 4                # ego f32, assume 2 buffers
    stream_bytes = 2 * (tk + tm) * Dp * 4
    ego_resident = fixed_bytes + resident_bytes <= vmem_budget
    vmem_limit = int(min(vmem_budget,
                         max(fixed_bytes + (resident_bytes if ego_resident
                                            else stream_bytes),
                             32 * 1024 * 1024)))

    # --- pad only when shapes aren't already tile-aligned -------------------
    if Np == N:
        a_pad = a_in.astype(a_dtype)
    else:
        a_pad = jnp.zeros((Np, Np), a_dtype).at[:N, :N].set(
            a_in.astype(a_dtype))
    if Np == N and Dp == D:
        ego_p = ego_embeddings.astype(jnp.float32)
    else:
        ego_p = jnp.zeros((Np, Dp), jnp.float32).at[:N, :D].set(
            ego_embeddings.astype(jnp.float32))

    w1t = jnp.zeros((Dp, Op), jnp.float32).at[:D, :out_dim].set(
        jnp.asarray(params["w1"], jnp.float32).T)
    w2t = jnp.zeros((Dp, Op), jnp.float32).at[:D, :out_dim].set(
        jnp.asarray(params["w2"], jnp.float32).T)
    b1 = jnp.zeros((1, Op), jnp.float32).at[0, :out_dim].set(
        jnp.asarray(params["b1"], jnp.float32))
    b2 = jnp.zeros((1, Op), jnp.float32).at[0, :out_dim].set(
        jnp.asarray(params["b2"], jnp.float32))

    grid = (Np // tm, Np // tk)
    w_specs = [
        pl.BlockSpec((Dp, Op), lambda i, k: (0, 0)),   # W1^T
        pl.BlockSpec((1, Op), lambda i, k: (0, 0)),    # b1
        pl.BlockSpec((Dp, Op), lambda i, k: (0, 0)),   # W2^T
        pl.BlockSpec((1, Op), lambda i, k: (0, 0)),    # b2
    ]

    if ego_resident:
        kernel = partial(_kernel_resident, tm=tm, tk=tk)
        in_specs = [pl.BlockSpec((tm, tk), lambda i, k: (i, k)),   # A_in tile
                    pl.BlockSpec((Np, Dp), lambda i, k: (0, 0)),   # ego resident
                    ] + w_specs
        operands = (a_pad, ego_p, w1t, b1, w2t, b2)
    else:
        kernel = _kernel_streamed
        in_specs = [pl.BlockSpec((tm, tk), lambda i, k: (i, k)),   # A_in tile
                    pl.BlockSpec((tk, Dp), lambda i, k: (k, 0)),   # ego SpMM rhs
                    pl.BlockSpec((tm, Dp), lambda i, k: (i, 0)),   # ego row block
                    ] + w_specs
        operands = (a_pad, ego_p, ego_p, w1t, b1, w2t, b2)  # same array twice

    out_pad = pl.pallas_call(
        kernel,
        out_shape=jax.ShapeDtypeStruct((Np, Op), jnp.float32),
        grid_spec=pltpu.PrefetchScalarGridSpec(
            num_scalar_prefetch=0,
            grid=grid,
            in_specs=in_specs,
            out_specs=pl.BlockSpec((tm, Op), lambda i, k: (i, 0)),
            scratch_shapes=[pltpu.VMEM((tm, Dp), jnp.float32)],
        ),
        compiler_params=pltpu.CompilerParams(
            dimension_semantics=("parallel", "arbitrary"),
            vmem_limit_bytes=vmem_limit),
    )(*operands)

    # TODO(synk): message_dropout is identity here (eval mode); training-mode
    # dropout would use pltpu.prng_seed / prng_random_bits inside the kernel.
    return out_pad[:N, :out_dim]


def xavier_uniform(key, shape):
    fan_out, fan_in = shape
    bound = jnp.sqrt(6.0 / (fan_in + fan_out))
    return jax.random.uniform(key, shape, jnp.float32, -bound, bound)


if __name__ == "__main__":
    # Module config: in_dim=32, out_dim=32, is_complex_embedding=True
    #   -> effective in_dim = out_dim = 64
    base_in_dim = 32
    base_out_dim = 32
    in_dim = 2 * base_in_dim
    out_dim = 2 * base_out_dim
    n_nodes = 256  # n_users + n_entities

    key = jax.random.PRNGKey(0)
    k_ego, k_a, k_w1, k_b1, k_w2, k_b2 = jax.random.split(key, 6)

    ego = jax.random.normal(k_ego, (n_nodes, in_dim), jnp.float32)
    # Sparse-ish row-normalized adjacency, materialized dense.
    a_raw = jax.random.uniform(k_a, (n_nodes, n_nodes), jnp.float32)
    a_mask = (a_raw > 0.9).astype(jnp.float32)
    a_in = a_mask / jnp.maximum(a_mask.sum(axis=1, keepdims=True), 1.0)

    bound = 1.0 / jnp.sqrt(jnp.float32(in_dim))
    params = {
        "w1": xavier_uniform(k_w1, (out_dim, in_dim)),
        "b1": jax.random.uniform(k_b1, (out_dim,), jnp.float32, -bound, bound),
        "w2": xavier_uniform(k_w2, (out_dim, in_dim)),
        "b2": jax.random.uniform(k_b2, (out_dim,), jnp.float32, -bound, bound),
    }

    hi = jax.lax.Precision.HIGHEST
    slope = 0.01

    # --- default (bf16 A stream) path: compare vs bf16-cast reference -------
    out = aggregator_forward(ego, a_in, params)
    out = jax.block_until_ready(out)
    a_bf = a_in.astype(jnp.bfloat16).astype(jnp.float32)
    e_bf = ego.astype(jnp.bfloat16).astype(jnp.float32)
    side_bf = jnp.matmul(a_bf, e_bf, precision=hi)
    h1 = jnp.matmul(ego + side_bf, params["w1"].T, precision=hi) + params["b1"]
    h2 = jnp.matmul(ego * side_bf, params["w2"].T, precision=hi) + params["b2"]
    ref_bf = jnp.maximum(h1, slope * h1) + jnp.maximum(h2, slope * h2)
    assert out.shape == (n_nodes, out_dim)
    assert jnp.allclose(out, ref_bf, atol=2e-3, rtol=2e-3), \
        float(jnp.max(jnp.abs(out - ref_bf)))

    # --- f32 A path: exact reference -----------------------------------------
    out32 = aggregator_forward(ego, a_in, params, a_dtype=jnp.float32)
    out32 = jax.block_until_ready(out32)
    side = jnp.matmul(a_in, ego, precision=hi)
    h1 = jnp.matmul(ego + side, params["w1"].T, precision=hi) + params["b1"]
    h2 = jnp.matmul(ego * side, params["w2"].T, precision=hi) + params["b2"]
    ref32 = jnp.maximum(h1, slope * h1) + jnp.maximum(h2, slope * h2)
    assert jnp.allclose(out32, ref32, atol=1e-4, rtol=1e-4), \
        float(jnp.max(jnp.abs(out32 - ref32)))

    print("KERNEL_OK")
</pallas_src>

<mosaic_0001>
module attributes {stable_mosaic.version = 11 : i64} {
  func.func @_kernel_resident(%arg0: i32, %arg1: i32, %arg2: memref<128x256xbf16, #tpu.memory_space<vmem>>, %arg3: memref<256x128xf32, #tpu.memory_space<vmem>>, %arg4: memref<128x128xf32, #tpu.memory_space<vmem>>, %arg5: memref<1x128xf32, #tpu.memory_space<vmem>>, %arg6: memref<128x128xf32, #tpu.memory_space<vmem>>, %arg7: memref<1x128xf32, #tpu.memory_space<vmem>>, %arg8: memref<128x128xf32, #tpu.memory_space<vmem>>, %arg9: memref<128x128xf32, #tpu.memory_space<vmem>>) attributes {dimension_semantics = [#tpu.dimension_semantics<parallel>, #tpu.dimension_semantics<arbitrary>], iteration_bounds = array<i64: 2, 1>, scalar_prefetch = 0 : i64, scratch_operands = 1 : i64, tpu.core_type = #tpu.core_type<tc>, window_params = [{transform_indices = @transform_0, window_bounds = array<i64: 128, 256>}, {pipeline_mode = #tpu.pipeline_mode<synchronous>, transform_indices = @transform_1, window_bounds = array<i64: 256, 128>}, {pipeline_mode = #tpu.pipeline_mode<synchronous>, transform_indices = @transform_2, window_bounds = array<i64: 128, 128>}, {pipeline_mode = #tpu.pipeline_mode<synchronous>, transform_indices = @transform_3, window_bounds = array<i64: 1, 128>}, {pipeline_mode = #tpu.pipeline_mode<synchronous>, transform_indices = @transform_4, window_bounds = array<i64: 128, 128>}, {pipeline_mode = #tpu.pipeline_mode<synchronous>, transform_indices = @transform_5, window_bounds = array<i64: 1, 128>}, {transform_indices = @transform_6, window_bounds = array<i64: 128, 128>}]} {
    %c0_i32 = arith.constant 0 : i32
    %0 = arith.cmpi eq, %arg1, %c0_i32 : i32
    %1 = arith.extui %0 : i1 to i32
    %c0_i32_0 = arith.constant 0 : i32
    %2 = arith.cmpi ne, %1, %c0_i32_0 : i32
    scf.if %2 {
      %cst_9 = arith.constant 0.000000e+00 : f32
      %16 = vector.broadcast %cst_9 : f32 to vector<128x128xf32>
      %c0_10 = arith.constant 0 : index
      %c0_11 = arith.constant 0 : index
      %17 = vector.load %arg9[%c0_10, %c0_11] : memref<128x128xf32, #tpu.memory_space<vmem>>, vector<128x128xf32>
      tpu.vector_store %arg9[%c0_10, %c0_11], %16 {strides = array<i32>} : memref<128x128xf32, #tpu.memory_space<vmem>>, vector<128x128xf32>,
    } else {
    }
    %c256_i32 = arith.constant 256 : i32
    %3 = arith.muli %arg1, %c256_i32 : i32
    %4 = tpu.assume_multiple %3, 256 : i32
    %5 = arith.index_cast %4 : i32 to index
    %c0 = arith.constant 0 : index
    %6 = vector.load %arg3[%5, %c0] : memref<256x128xf32, #tpu.memory_space<vmem>>, vector<256x128xf32>
    %7 = arith.truncf %6 : vector<256x128xf32> to vector<256x128xbf16>
    %c0_1 = arith.constant 0 : index
    %c0_2 = arith.constant 0 : index
    %8 = vector.load %arg9[%c0_1, %c0_2] : memref<128x128xf32, #tpu.memory_space<vmem>>, vector<128x128xf32>
    %c0_3 = arith.constant 0 : index
    %c0_4 = arith.constant 0 : index
    %9 = vector.load %arg2[%c0_3, %c0_4] : memref<128x256xbf16, #tpu.memory_space<vmem>>, vector<128x256xbf16>
    %cst = arith.constant dense<0.000000e+00> : vector<128x128xf32>
    %10 = tpu.matmul %9, %7, %cst {dimension_numbers = #tpu.dot_dimension_numbers<[1], [0], [0], [1], [0, 0, 1, 1], [], []>} : vector<128x256xbf16>, vector<256x128xbf16>, vector<128x128xf32> -> vector<128x128xf32>
    %11 = arith.addf %8, %10 : vector<128x128xf32>
    %c0_5 = arith.constant 0 : index
    %c0_6 = arith.constant 0 : index
    %12 = vector.load %arg9[%c0_5, %c0_6] : memref<128x128xf32, #tpu.memory_space<vmem>>, vector<128x128xf32>
    tpu.vector_store %arg9[%c0_5, %c0_6], %11 {strides = array<i32>} : memref<128x128xf32, #tpu.memory_space<vmem>>, vector<128x128xf32>,
    %c0_i32_7 = arith.constant 0 : i32
    %13 = arith.cmpi eq, %arg1, %c0_i32_7 : i32
    %14 = arith.extui %13 : i1 to i32
    %c0_i32_8 = arith.constant 0 : i32
    %15 = arith.cmpi ne, %14, %c0_i32_8 : i32
    scf.if %15 {
      %c128_i32 = arith.constant 128 : i32
      %16 = arith.muli %arg0, %c128_i32 : i32
      %17 = tpu.assume_multiple %16, 128 : i32
      %18 = arith.index_cast %17 : i32 to index
      %c0_9 = arith.constant 0 : index
      %19 = vector.load %arg3[%18, %c0_9] : memref<256x128xf32, #tpu.memory_space<vmem>>, vector<128x128xf32>
      %c0_10 = arith.constant 0 : index
      %c0_11 = arith.constant 0 : index
      %20 = vector.load %arg9[%c0_10, %c0_11] : memref<128x128xf32, #tpu.memory_space<vmem>>, vector<128x128xf32>
      %21 = arith.addf %19, %20 : vector<128x128xf32>
      %c0_12 = arith.constant 0 : index
      %c0_13 = arith.constant 0 : index
      %22 = vector.load %arg4[%c0_12, %c0_13] : memref<128x128xf32, #tpu.memory_space<vmem>>, vector<128x128xf32>
      %cst_14 = arith.constant dense<0.000000e+00> : vector<128x128xf32>
      %23 = tpu.matmul %21, %22, %cst_14 {dimension_numbers = #tpu.dot_dimension_numbers<[1], [0], [0], [1], [0, 0, 1, 1], [], []>} : vector<128x128xf32>, vector<128x128xf32>, vector<128x128xf32> -> vector<128x128xf32>
      %c0_15 = arith.constant 0 : index
      %c0_16 = arith.constant 0 : index
      %24 = vector.load %arg5[%c0_15, %c0_16] : memref<1x128xf32, #tpu.memory_space<vmem>>, vector<1x128xf32>
      %25 = vector.broadcast %24 : vector<1x128xf32> to vector<128x128xf32>
      %26 = arith.addf %23, %25 : vector<128x128xf32>
      %cst_17 = arith.constant 0.00999999977 : f32
      %27 = vector.broadcast %cst_17 : f32 to vector<128x128xf32>
      %28 = arith.mulf %27, %26 : vector<128x128xf32>
      %29 = arith.maximumf %26, %28 : vector<128x128xf32>
      %c0_18 = arith.constant 0 : index
      %c0_19 = arith.constant 0 : index
      %30 = vector.load %arg8[%c0_18, %c0_19] : memref<128x128xf32, #tpu.memory_space<vmem>>, vector<128x128xf32>
      tpu.vector_store %arg8[%c0_18, %c0_19], %29 {strides = array<i32>} : memref<128x128xf32, #tpu.memory_space<vmem>>, vector<128x128xf32>,
      %31 = arith.mulf %19, %20 : vector<128x128xf32>
      %c0_20 = arith.constant 0 : index
      %c0_21 = arith.constant 0 : index
      %32 = vector.load %arg6[%c0_20, %c0_21] : memref<128x128xf32, #tpu.memory_space<vmem>>, vector<128x128xf32>
      %cst_22 = arith.constant dense<0.000000e+00> : vector<128x128xf32>
      %33 = tpu.matmul %31, %32, %cst_22 {dimension_numbers = #tpu.dot_dimension_numbers<[1], [0], [0], [1], [0, 0, 1, 1], [], []>} : vector<128x128xf32>, vector<128x128xf32>, vector<128x128xf32> -> vector<128x128xf32>
      %c0_23 = arith.constant 0 : index
      %c0_24 = arith.constant 0 : index
      %34 = vector.load %arg7[%c0_23, %c0_24] : memref<1x128xf32, #tpu.memory_space<vmem>>, vector<1x128xf32>
      %35 = vector.broadcast %34 : vector<1x128xf32> to vector<128x128xf32>
      %36 = arith.addf %33, %35 : vector<128x128xf32>
      %c0_25 = arith.constant 0 : index
      %c0_26 = arith.constant 0 : index
      %37 = vector.load %arg8[%c0_25, %c0_26] : memref<128x128xf32, #tpu.memory_space<vmem>>, vector<128x128xf32>
      %cst_27 = arith.constant 0.00999999977 : f32
      %38 = vector.broadcast %cst_27 : f32 to vector<128x128xf32>
      %39 = arith.mulf %38, %36 : vector<128x128xf32>
      %40 = arith.maximumf %36, %39 : vector<128x128xf32>
      %41 = arith.addf %37, %40 : vector<128x128xf32>
      %c0_28 = arith.constant 0 : index
      %c0_29 = arith.constant 0 : index
      %42 = vector.load %arg8[%c0_28, %c0_29] : memref<128x128xf32, #tpu.memory_space<vmem>>, vector<128x128xf32>
      tpu.vector_store %arg8[%c0_28, %c0_29], %41 {strides = array<i32>} : memref<128x128xf32, #tpu.memory_space<vmem>>, vector<128x128xf32>,
    } else {
    }
    return
  }
  func.func @transform_0(%arg0: i32, %arg1: i32) -> (i32, i32) {
    %c0_i32 = arith.constant 0 : i32
    return %arg0, %arg1 : i32, i32
  }
  func.func @transform_1(%arg0: i32, %arg1: i32) -> (i32, i32) {
    %c0_i32 = arith.constant 0 : i32
    %c0_i32_0 = arith.constant 0 : i32
    %c0_i32_1 = arith.constant 0 : i32
    return %c0_i32, %c0_i32_0 : i32, i32
  }
  func.func @transform_2(%arg0: i32, %arg1: i32) -> (i32, i32) {
    %c0_i32 = arith.constant 0 : i32
    %c0_i32_0 = arith.constant 0 : i32
    %c0_i32_1 = arith.constant 0 : i32
    return %c0_i32, %c0_i32_0 : i32, i32
  }
  func.func @transform_3(%arg0: i32, %arg1: i32) -> (i32, i32) {
    %c0_i32 = arith.constant 0 : i32
    %c0_i32_0 = arith.constant 0 : i32
    %c0_i32_1 = arith.constant 0 : i32
    return %c0_i32, %c0_i32_0 : i32, i32
  }
  func.func @transform_4(%arg0: i32, %arg1: i32) -> (i32, i32) {
    %c0_i32 = arith.constant 0 : i32
    %c0_i32_0 = arith.constant 0 : i32
    %c0_i32_1 = arith.constant 0 : i32
    return %c0_i32, %c0_i32_0 : i32, i32
  }
  func.func @transform_5(%arg0: i32, %arg1: i32) -> (i32, i32) {
    %c0_i32 = arith.constant 0 : i32
    %c0_i32_0 = arith.constant 0 : i32
    %c0_i32_1 = arith.constant 0 : i32
    return %c0_i32, %c0_i32_0 : i32, i32
  }
  func.func @transform_6(%arg0: i32, %arg1: i32) -> (i32, i32) {
    %c0_i32 = arith.constant 0 : i32
    %c0_i32_0 = arith.constant 0 : i32
    return %arg0, %c0_i32 : i32, i32
  }
}

</mosaic_0001>

<bundles_post_ra>
// kernel: aggregator_forward.1
= control target key start
LH: loop header
LB: loop body
LE: loop exit
PB: predicated region body
PF: predicated region fallthrough
CT: control target
= control target key end

     0   :  { %s1649_s21 = smov 0   ;;  %s1651_s22 = smov 0   ;;  %s2073_s0 = inlined_call_operand.vmem [shape: bf16[256,256], index: 0, kind: input, shape index: {}]   ;;  %s2074_s1 = inlined_call_operand.vmem [shape: f32[256,128], index: 1, kind: input, shape index: {}]   ;;  %s2075_s2 = inlined_call_operand.vmem [shape: f32[128,128], index: 2, kind: input, shape index: {}]   ;;  %s2076_s3 = inlined_call_operand.vmem [shape: f32[1,128], index: 3, kind: input, shape index: {}]   ;;  %s2077_s4 = inlined_call_operand.vmem [shape: f32[128,128], index: 4, kind: input, shape index: {}]   ;;  %s2078_s5 = inlined_call_operand.vmem [shape: f32[1,128], index: 5, kind: input, shape index: {}]   ;;  %s2079_s6 = inlined_call_operand.vmem [shape: f32[256,128], index: 6, kind: output, shape index: {}]  }
   0x1   :  { %s1653_s23 = smov 0  }
   0x2 LB: > { %s28_s24 = sadd.s32 1, %s1608_s22  ;;  %p1210_p0 = scmp.ge.s32.totalorder %s1612_s23, 1  ;;  %s1612_s23 = sphi %s1653_s23, %s16_s23   ;;  %s1608_s22 = sphi %s1651_s22, %s2081_s22   ;;  %s1604_s21 = sphi %s1649_s21, %s2080_s21  }
   0x3   : > { %p30_p1 = scmp.ge.s32.totalorder %s28_s24, 2  ;;  %p233_p2 = scmp.lt.s32.totalorder %s1612_s23, 3 }
   0x5   : > { %s2083_s24 = smov (%p30_p1, %s28_s24), 0  ;;  %p234_p3 = pnand %p1210_p0, %p233_p2 }
   0x6   : > { %v325_v0 = vld [vmem:[%s2074_s1 + $0x80] sm:$0xff] (!%p234_p3)  ;;  %v326_v1 = vld [vmem:[%s2074_s1 + $0x88] sm:$0xff] (!%p234_p3)  ;;  %s1211_s7 = sshll.u32 (!%p234_p3), %s1604_s21, 4  ;;  %v327_v5 = vld [vmem:[%s2074_s1 + $0x90] sm:$0xff] (!%p234_p3)  ;;  %s1232_s18 = sshll.u32 (!%p234_p3), %s1604_s21, 7 }
   0x7   : > { %237 = sbr.rel (%p234_p3) target bundleno = 570 (0x23a), region = 44  ;;  %v309_v2 = vld [vmem:[%s2074_s1] sm:$0xff] (!%p234_p3)  ;;  %v349_v3 = vpack.c.bf16 (!%p234_p3), %v326_v1, %v325_v0  ;;  %v310_v4 = vld [vmem:[%s2074_s1 + $0x8] sm:$0xff] (!%p234_p3)  ;;  %v328_v6 = vld [vmem:[%s2074_s1 + $0x98] sm:$0xff] (!%p234_p3)  ;;  %p270_p4 = scmp.lt.s32.totalorder (!%p234_p3), %s1211_s7, 31 }
   0x8   : > { %v341_v7 = vpack.c.bf16 (!%p234_p3), %v310_v4, %v309_v2  ;;  %v350_v8 = vpack.c.bf16 (!%p234_p3), %v328_v6, %v327_v5  ;;  %v311_v9 = vld [vmem:[%s2074_s1 + $0x10] sm:$0xff] (!%p234_p3)  ;;  %v312_v10 = vld [vmem:[%s2074_s1 + $0x18] sm:$0xff] (!%p234_p3)  ;;  %v329_v11 = vld [vmem:[%s2074_s1 + $0xa0] sm:$0xff] (!%p234_p3)  ;;  %s1850_s25 = scalar_lea.vmem (!%p234_p3), %s2074_s1, %s1232_s18 }
   0x9   : > { %1238 = vmatprep.subr.bf16.mxu0 (!%p234_p3), %v349_v3  ;;  %v330_v12 = vld [vmem:[%s2074_s1 + $0xa8] sm:$0xff] (!%p234_p3)  ;;  %v342_v13 = vpack.c.bf16 (!%p234_p3), %v312_v10, %v311_v9  ;;  %v313_v15 = vld [vmem:[%s2074_s1 + $0x20] sm:$0xff] (!%p234_p3)  ;;  %v331_v17 = vld [vmem:[%s2074_s1 + $0xb0] sm:$0xff] (!%p234_p3) }
   0xa   : > { %1239 = vmatpush3.bf16.msra.mxu0 (!%p234_p3), %v341_v7  ;;  %v351_v14 = vpack.c.bf16 (!%p234_p3), %v330_v12, %v329_v11  ;;  %v314_v16 = vld [vmem:[%s2074_s1 + $0x28] sm:$0xff] (!%p234_p3)  ;;  %v332_v18 = vld [vmem:[%s2074_s1 + $0xb8] sm:$0xff] (!%p234_p3)  ;;  %v315_v21 = vld [vmem:[%s2074_s1 + $0x30] sm:$0xff] (!%p234_p3) }
   0xb   : > { %1240 = vmatprep.subr.bf16.mxu0 (!%p234_p3), %v350_v8  ;;  %v343_v19 = vpack.c.bf16 (!%p234_p3), %v314_v16, %v313_v15  ;;  %v352_v20 = vpack.c.bf16 (!%p234_p3), %v332_v18, %v331_v17  ;;  %v316_v22 = vld [vmem:[%s2074_s1 + $0x38] sm:$0xff] (!%p234_p3)  ;;  %v333_v23 = vld [vmem:[%s2074_s1 + $0xc0] sm:$0xff] (!%p234_p3)  ;;  %v334_v24 = vld [vmem:[%s2074_s1 + $0xc8] sm:$0xff] (!%p234_p3) }
   0xc   : > { %v344_v26 = vpack.c.bf16 (!%p234_p3), %v316_v22, %v315_v21  ;;  %v317_v27 = vld [vmem:[%s2074_s1 + $0x40] sm:$0xff] (!%p234_p3)  ;;  %v353_v28 = vpack.c.bf16 (!%p234_p3), %v334_v24, %v333_v23  ;;  %v318_v29 = vld [vmem:[%s2074_s1 + $0x48] sm:$0xff] (!%p234_p3)  ;;  %v335_v30 = vld [vmem:[%s2074_s1 + $0xd0] sm:$0xff] (!%p234_p3) }
   0xd   : > { %v336_v31 = vld [vmem:[%s2074_s1 + $0xd8] sm:$0xff] (!%p234_p3)  ;;  %v345_v32 = vpack.c.bf16 (!%p234_p3), %v318_v29, %v317_v27  ;;  %v319_v33 = vld [vmem:[%s2074_s1 + $0x50] sm:$0xff] (!%p234_p3)  ;;  %v337_v36 = vld [vmem:[%s2074_s1 + $0xe0] sm:$0xff] (!%p234_p3) }
   0xe   : > { %s2085_s7 = smov (!%p270_p4, %s1211_s7), 31  ;;  %1241 = vmatpush3.bf16.msra.mxu0 %v342_v13  ;;  %v354_v34 = vpack.c.bf16 %v336_v31, %v335_v30  ;;  %v320_v35 = vld [vmem:[%s2074_s1 + $0x58] sm:$0xff]  ;;  %v338_v37 = vld [vmem:[%s2074_s1 + $0xe8] sm:$0xff]  ;;  %v321_v38 = vld [vmem:[%s2074_s1 + $0x60] sm:$0xff] }
   0xf   : > { %s1237_s30 = sshll.u32 %s2085_s7, 3  ;;  %1242 = vmatprep.subr.bf16.mxu0 %v351_v14  ;;  %v346_v39 = vpack.c.bf16 %v320_v35, %v319_v33  ;;  %v322_v40 = vld [vmem:[%s2074_s1 + $0x68] sm:$0xff]  ;;  %v355_v41 = vpack.c.bf16 %v338_v37, %v337_v36  ;;  %v339_v42 = vld [vmem:[%s2074_s1 + $0xf0] sm:$0xff]  ;;  %v651_v43 = vld [vmem:[%s2075_s2] sm:$0xff] }
  0x10   : > { %s1720_s14 = scalar_lea.vmem %s2073_s0, %s1237_s30  ;;  %v652_v44 = vld [vmem:[%s2075_s2 + $0x8] sm:$0xff]  ;;  %v340_v45 = vld [vmem:[%s2074_s1 + $0xf8] sm:$0xff]  ;;  %v653_v47 = vld [vmem:[%s2075_s2 + $0x10] sm:$0xff]  ;;  %v347_v52 = vpack.c.bf16 %v322_v40, %v321_v38  ;;  %s2016_s18 = scalar_lea.vmem %s2079_s6, %s1237_s30 }
  0x11   : > { %v1568_v25 = vld [vmem:[%s1720_s14 + $0x4] ss:$8 sps:$4 sm:$0xff]   ;;  %v1478_v46 = vpack.c.bf16 %v652_v44, %v651_v43  ;;  %v654_v48 = vld [vmem:[%s2075_s2 + $0x18] sm:$0xff]  ;;  %v356_v53 = vpack.c.bf16 %v340_v45, %v339_v42  ;;  %v323_v54 = vld [vmem:[%s2074_s1 + $0x70] sm:$0xff] }
  0x12   : > { %1243 = vmatpush3.bf16.msra.mxu0 %v343_v19  ;;  %501 = vmatprep.mubr.bf16.mxu0 %v1568_v25  ;;  %v1482_v49 = vpack.c.bf16 %v654_v48, %v653_v47  ;;  %v655_v50 = vld [vmem:[%s2075_s2 + $0x20] sm:$0xff]  ;;  %v656_v51 = vld [vmem:[%s2075_s2 + $0x28] sm:$0xff]  ;;  %v324_v55 = vld [vmem:[%s2074_s1 + $0x78] sm:$0xff] }
  0x13   : > { %1244 = vmatprep.subr.bf16.mxu0 %v352_v20  ;;  %1479 = vmatprep.subr.bf16.mxu1 %v1478_v46  ;;  %v1486_v56 = vpack.c.bf16 %v656_v51, %v655_v50  ;;  %v657_v57 = vld [vmem:[%s2075_s2 + $0x30] sm:$0xff]  ;;  %v658_v58 = vld [vmem:[%s2075_s2 + $0x38] sm:$0xff]  ;;  %v348_v59 = vpack.c.bf16 %v324_v55, %v323_v54  ;;  %v1566_v61 = vld [vmem:[%s1720_s14] ss:$8 sps:$4 sm:$0xff]  }
  0x14   : > { %1481 = vmatpush3.bf16.msra.mxu1 %v1478_v46  ;;  %v1490_v60 = vpack.c.bf16 %v658_v58, %v657_v57  ;;  %v659_v62 = vld [vmem:[%s2075_s2 + $0x40] sm:$0xff]  ;;  %v660_v63 = vld [vmem:[%s2075_s2 + $0x48] sm:$0xff]  ;;  %v1569_v0 = vld [vmem:[%s1720_s14 + $0x14] ss:$8 sps:$4 sm:$0xff]  }
  0x15   : > { %1483 = vmatprep.subr.bf16.mxu1 %v1482_v49  ;;  %v1494_v1 = vpack.c.bf16 %v660_v63, %v659_v62  ;;  %v661_v2 = vld [vmem:[%s2075_s2 + $0x50] sm:$0xff]  ;;  %v662_v3 = vld [vmem:[%s2075_s2 + $0x58] sm:$0xff]  ;;  %v1572_v6 = vld [vmem:[%s1720_s14 + $0x24] ss:$8 sps:$4 sm:$0xff]  }
  0x16   : > { %1245 = vmatpush3.bf16.msra.mxu0 %v344_v26  ;;  %v1498_v4 = vpack.c.bf16 %v662_v3, %v661_v2  ;;  %v1571_v5 = vld [vmem:[%s1720_s14 + $0x10] ss:$8 sps:$4 sm:$0xff]   ;;  %v1574_v7 = vld [vmem:[%s1720_s14 + $0x20] ss:$8 sps:$4 sm:$0xff]   ;;  %v1575_v8 = vld [vmem:[%s1720_s14 + $0x34] ss:$8 sps:$4 sm:$0xff]  }
  0x17   : > { %1246 = vmatprep.subr.bf16.mxu0 %v353_v28  ;;  %v1577_v9 = vld [vmem:[%s1720_s14 + $0x30] ss:$8 sps:$4 sm:$0xff]   ;;  %v1578_v10 = vld [vmem:[%s1720_s14 + $0x44] ss:$8 sps:$4 sm:$0xff]   ;;  %v1580_v11 = vld [vmem:[%s1720_s14 + $0x40] ss:$8 sps:$4 sm:$0xff]  }
  0x18   : > { %1485 = vmatpush3.bf16.msra.mxu1 %v1482_v49  ;;  %v1581_v12 = vld [vmem:[%s1720_s14 + $0x54] ss:$8 sps:$4 sm:$0xff]   ;;  %v1583_v13 = vld [vmem:[%s1720_s14 + $0x50] ss:$8 sps:$4 sm:$0xff]   ;;  %v1584_v14 = vld [vmem:[%s1720_s14 + $0x64] ss:$8 sps:$4 sm:$0xff]  }
  0x19   : > { %1487 = vmatprep.subr.bf16.mxu1 %v1486_v56  ;;  %v1586_v15 = vld [vmem:[%s1720_s14 + $0x60] ss:$8 sps:$4 sm:$0xff]   ;;  %v1587_v16 = vld [vmem:[%s1720_s14 + $0x74] ss:$8 sps:$4 sm:$0xff]   ;;  %v1589_v17 = vld [vmem:[%s1720_s14 + $0x70] ss:$8 sps:$4 sm:$0xff]  }
  0x1a   : > { %1247 = vmatpush3.bf16.msra.mxu0 %v345_v32  ;;  %v663_v18 = vld [vmem:[%s2075_s2 + $0x60] sm:$0xff]  ;;  %v664_v19 = vld [vmem:[%s2075_s2 + $0x68] sm:$0xff]  ;;  %v665_v21 = vld [vmem:[%s2075_s2 + $0x70] sm:$0xff] }
  0x1b   : > { %1248 = vmatprep.subr.bf16.mxu0 %v354_v34  ;;  %v1502_v20 = vpack.c.bf16 %v664_v19, %v663_v18  ;;  %v666_v22 = vld [vmem:[%s2075_s2 + $0x78] sm:$0xff]  ;;  %v883_v24 = vld [vmem:[%s2077_s4] sm:$0xff]  ;;  %v884_v25 = vld [vmem:[%s2077_s4 + $0x8] sm:$0xff] }
  0x1c   : > { %1489 = vmatpush3.bf16.msra.mxu1 %v1486_v56  ;;  %v1506_v23 = vpack.c.bf16 %v666_v22, %v665_v21  ;;  %v1510_v26 = vpack.c.bf16 %v884_v25, %v883_v24  ;;  %v1853_v29 = vld [vmem:[%s1850_s25] sm:$0xff]  ;;  %v1858_v33 = vld [vmem:[%s1850_s25 + $0x8] sm:$0xff]  ;;  %v885_v34 = vld [vmem:[%s2077_s4 + $0x10] sm:$0xff] }
  0x1d   : > { %1491 = vmatprep.subr.bf16.mxu1 %v1490_v60  ;;  %v886_v35 = vld [vmem:[%s2077_s4 + $0x18] sm:$0xff]  ;;  %v887_v40 = vld [vmem:[%s2077_s4 + $0x20] sm:$0xff]  ;;  %v1879_v44 = vld [vmem:[%s1850_s25 + $0x10] sm:$0xff] }
  0x1e   : > { %1249 = vmatpush3.bf16.msra.mxu0 %v346_v39  ;;  %v1514_v39 = vpack.c.bf16 %v886_v35, %v885_v34  ;;  %v1884_v49 = vld [vmem:[%s1850_s25 + $0x18] sm:$0xff]  ;;  %v889_v50 = vld [vmem:[%s2077_s4 + $0x30] sm:$0xff]  ;;  %v891_v56 = vld [vmem:[%s2077_s4 + $0x40] sm:$0xff] }
  0x1f   : > { %1250 = vmatprep.subr.bf16.mxu0 %v355_v41  ;;  %v888_v41 = vld [vmem:[%s2077_s4 + $0x28] sm:$0xff]  ;;  %v890_v51 = vld [vmem:[%s2077_s4 + $0x38] sm:$0xff]  ;;  %v893_v2 = vld [vmem:[%s2077_s4 + $0x50] sm:$0xff] }
  0x20   : > { %1493 = vmatpush3.bf16.msra.mxu1 %v1490_v60  ;;  %v1518_v47 = vpack.c.bf16 %v888_v41, %v887_v40  ;;  %v1522_v55 = vpack.c.bf16 %v890_v51, %v889_v50  ;;  %v892_v57 = vld [vmem:[%s2077_s4 + $0x48] sm:$0xff]  ;;  %v1905_v60 = vld [vmem:[%s1850_s25 + $0x20] sm:$0xff]  ;;  %v894_v3 = vld [vmem:[%s2077_s4 + $0x58] sm:$0xff] }
  0x21   : > { %1495 = vmatprep.subr.bf16.mxu1 %v1494_v1  ;;  %v1526_v63 = vpack.c.bf16 %v892_v57, %v891_v56  ;;  %v897_v18 = vld [vmem:[%s2077_s4 + $0x70] sm:$0xff]  ;;  %v898_v19 = vld [vmem:[%s2077_s4 + $0x78] sm:$0xff] }
  0x22   : > { %1251 = vmatpush3.bf16.msra.mxu0 %v347_v52  ;;  %v613_v40 = vld [vmem:[%s1850_s25 + $0x50] sm:$0xff] }
  0x23   : > { %1252 = vmatprep.subr.bf16.mxu0 %v356_v53 }
  0x24   : > { %1497 = vmatpush3.bf16.msra.mxu1 %v1494_v1  ;;  %v1910_v1 = vld [vmem:[%s1850_s25 + $0x28] sm:$0xff] }
  0x25   : > { %1499 = vmatprep.subr.bf16.mxu1 %v1498_v4 }
  0x26   : > { %1253 = vmatpush3.bf16.msra.mxu0 %v348_v59 }
  0x28   : > { %1501 = vmatpush3.bf16.msra.mxu1 %v1498_v4 }
  0x29   : > { %502 = vmatmul.mubr.bf16.vlgmr.msra.gmra.mrb[0].mxu0 %v1566_v61  ;;  %1503 = vmatprep.subr.bf16.mxu1 %v1502_v20 }
  0x2a   : > { %509 = vmatprep.mubr.bf16.mxu0 %v1569_v0 }
  0x2c   : > { %1505 = vmatpush3.bf16.msra.mxu1 %v1502_v20 }
  0x2d   : > { %1507 = vmatprep.subr.bf16.mxu1 %v1506_v23 }
  0x30   : > { %1509 = vmatpush3.bf16.msra.mxu1 %v1506_v23  ;;  %v1538_v23 = vpack.c.bf16 %v898_v19, %v897_v18 }
  0x31   : > { %510 = vmatmul.mubr.bf16.gmra.mrb[4].mxu0 %v1571_v5  ;;  %1511 = vmatprep.subr.bf16.mxu1 %v1510_v26 }
  0x32   : > { %517 = vmatprep.mubr.bf16.mxu0 %v1572_v6 }
  0x39   : > { %518 = vmatmul.mubr.bf16.gmra.mrb[8].mxu0 %v1574_v7  ;;  %v1530_v7 = vpack.c.bf16 %v894_v3, %v893_v2  ;;  %v617_v3 = vld [vmem:[%s1850_s25 + $0x70] sm:$0xff] }
  0x3a   : > { %525 = vmatprep.mubr.bf16.mxu0 %v1575_v8  ;;  %v895_v8 = vld [vmem:[%s2077_s4 + $0x60] sm:$0xff] }
  0x41   : > { %526 = vmatmul.mubr.bf16.gmra.mrb[12].mxu0 %v1577_v9  ;;  %v896_v9 = vld [vmem:[%s2077_s4 + $0x68] sm:$0xff] }
  0x42   : > { %533 = vmatprep.mubr.bf16.mxu0 %v1578_v10 }
  0x49   : > { %534 = vmatmul.mubr.bf16.gmra.mrb[16].mxu0 %v1580_v11 }
  0x4a   : > { %541 = vmatprep.mubr.bf16.mxu0 %v1581_v12  ;;  %v1931_v12 = vld [vmem:[%s1850_s25 + $0x30] sm:$0xff] }
  0x51   : > { %542 = vmatmul.mubr.bf16.gmra.mrb[20].mxu0 %v1583_v13 }
  0x52   : > { %549 = vmatprep.mubr.bf16.mxu0 %v1584_v14 }
  0x59   : > { %550 = vmatmul.mubr.bf16.gmra.mrb[24].mxu0 %v1586_v15  ;;  %v1534_v15 = vpack.c.bf16 %v896_v9, %v895_v8  ;;  %v618_v8 = vld [vmem:[%s1850_s25 + $0x78] sm:$0xff] }
  0x5a   : > { %557 = vmatprep.mubr.bf16.mxu0 %v1587_v16 }
  0x61   : > { %558 = vmatmul.mubr.bf16.gmra.mrb[28].mxu0 %v1589_v17  ;;  %v1936_v17 = vld [vmem:[%s1850_s25 + $0x38] sm:$0xff] }
  0xfc   : > { %v1254_v27 = vpop.f32.mrb[0].mxu0 }
  0xfd   : > { %v1255_v28 = vpop.f32.mrb[1].mxu0 }
  0xfe   : > { %v1855_v30 = vadd.f32 %v1255_v28, %v1254_v27  ;;  %v1257_v31 = vpop.f32.mrb[2].mxu0 }
  0xff   : > { %v1258_v32 = vpop.f32.mrb[3].mxu0 }
 0x100   : > { %v1866_v36 = vadd.f32 %v1258_v32, %v1257_v31  ;;  %v635_v37 = vadd.f32 %v1855_v30, %v1853_v29  ;;  %v612_v32 = vld [vmem:[%s1850_s25 + $0x48] sm:$0xff] }
 0x102   : > { %v636_v38 = vadd.f32 %v1866_v36, %v1858_v33  ;;  %1398 = vmatprep.mubr.f32.mxu1 %v635_v37 }
 0x104   : > { %v1260_v42 = vpop.f32.mrb[4].mxu0  ;;  %1399 = vmatmul.mubr.f32.vlgmr.msra.gmra.mrb[0].mxu1 %v636_v38 }
 0x105   : > { %v1261_v43 = vpop.f32.mrb[5].mxu0  ;;  %1513 = vmatpush3.bf16.msra.mxu1 %v1510_v26  ;;  %v1951_v26 = vld [vmem:[%s1850_s25 + $0x40] sm:$0xff] }
 0x106   : > { %v1881_v45 = vadd.f32 %v1261_v43, %v1260_v42  ;;  %v1263_v46 = vpop.f32.mrb[6].mxu0  ;;  %1515 = vmatprep.subr.bf16.mxu1 %v1514_v39 }
 0x107   : > { %v1264_v48 = vpop.f32.mrb[7].mxu0 }
 0x108   : > { %v637_v52 = vadd.f32 %v1881_v45, %v1879_v44  ;;  %v1894_v53 = vadd.f32 %v1264_v48, %v1263_v46  ;;  %v614_v46 = vld [vmem:[%s1850_s25 + $0x58] sm:$0xff] }
 0x109   : > { %1517 = vmatpush3.bf16.msra.mxu1 %v1514_v39 }
 0x10a   : > { %v638_v54 = vadd.f32 %v1894_v53, %v1884_v49  ;;  %1401 = vmatprep.mubr.f32.mxu1 %v637_v52  ;;  %1519 = vmatprep.subr.bf16.mxu1 %v1518_v47  ;;  %v870_v18 = vmul.f32 %v1894_v53, %v1884_v49 }
 0x10c   : > { %v1266_v58 = vpop.f32.mrb[8].mxu0  ;;  %1402 = vmatmul.mubr.f32.gmra.mrb[2].mxu1 %v638_v54  ;;  %v615_v54 = vld [vmem:[%s1850_s25 + $0x60] sm:$0xff] }
 0x10d   : > { %v1267_v59 = vpop.f32.mrb[9].mxu0  ;;  %1521 = vmatpush3.bf16.msra.mxu1 %v1518_v47 }
 0x10e   : > { %v1907_v61 = vadd.f32 %v1267_v59, %v1266_v58  ;;  %v1269_v62 = vpop.f32.mrb[10].mxu0  ;;  %1523 = vmatprep.subr.bf16.mxu1 %v1522_v55  ;;  %v616_v58 = vld [vmem:[%s1850_s25 + $0x68] sm:$0xff] }
 0x10f   : > { %v1270_v0 = vpop.f32.mrb[11].mxu0 }
 0x110   : > { %v639_v4 = vadd.f32 %v1907_v61, %v1905_v60  ;;  %v1920_v5 = vadd.f32 %v1270_v0, %v1269_v62  ;;  %v871_v19 = vmul.f32 %v1907_v61, %v1905_v60 }
 0x111   : > { %1525 = vmatpush3.bf16.msra.mxu1 %v1522_v55 }
 0x112   : > { %v640_v6 = vadd.f32 %v1920_v5, %v1910_v1  ;;  %1404 = vmatprep.mubr.f32.mxu1 %v639_v4  ;;  %1527 = vmatprep.subr.bf16.mxu1 %v1526_v63 }
 0x114   : > { %v1272_v10 = vpop.f32.mrb[12].mxu0  ;;  %1405 = vmatmul.mubr.f32.gmra.mrb[4].mxu1 %v640_v6 }
 0x115   : > { %v1273_v11 = vpop.f32.mrb[13].mxu0  ;;  %1529 = vmatpush3.bf16.msra.mxu1 %v1526_v63 }
 0x116   : > { %v1933_v13 = vadd.f32 %v1273_v11, %v1272_v10  ;;  %v1275_v14 = vpop.f32.mrb[14].mxu0  ;;  %1531 = vmatprep.subr.bf16.mxu1 %v1530_v7 }
 0x117   : > { %v1276_v16 = vpop.f32.mrb[15].mxu0 }
 0x118   : > { %v641_v20 = vadd.f32 %v1933_v13, %v1931_v12  ;;  %v1946_v21 = vadd.f32 %v1276_v16, %v1275_v14  ;;  %v867_v14 = vmul.f32 %v1855_v30, %v1853_v29  ;;  %v869_v16 = vmul.f32 %v1881_v45, %v1879_v44 }
 0x119   : > { %1533 = vmatpush3.bf16.msra.mxu1 %v1530_v7  ;;  %v872_v29 = vmul.f32 %v1920_v5, %v1910_v1  ;;  %v873_v30 = vmul.f32 %v1933_v13, %v1931_v12 }
 0x11a   : > { %v642_v22 = vadd.f32 %v1946_v21, %v1936_v17  ;;  %1407 = vmatprep.mubr.f32.mxu1 %v641_v20  ;;  %1535 = vmatprep.subr.bf16.mxu1 %v1534_v15 }
 0x11c   : > { %v1278_v24 = vpop.f32.mrb[16].mxu0  ;;  %1408 = vmatmul.mubr.f32.gmra.mrb[6].mxu1 %v642_v22 }
 0x11d   : > { %v1279_v25 = vpop.f32.mrb[17].mxu0  ;;  %1537 = vmatpush3.bf16.msra.mxu1 %v1534_v15  ;;  %v868_v15 = vmul.f32 %v1866_v36, %v1858_v33  ;;  %v874_v33 = vmul.f32 %v1946_v21, %v1936_v17 }
 0x11e   : > { %v1280_v27 = vadd.f32 %v1279_v25, %v1278_v24  ;;  %v1281_v28 = vpop.f32.mrb[18].mxu0  ;;  %1539 = vmatprep.subr.bf16.mxu1 %v1538_v23 }
 0x11f   : > { %v1282_v31 = vpop.f32.mrb[19].mxu0 }
 0x120   : > { %v643_v34 = vadd.f32 %v1280_v27, %v1951_v26  ;;  %v1283_v35 = vadd.f32 %v1282_v31, %v1281_v28  ;;  %v875_v36 = vmul.f32 %v1280_v27, %v1951_v26 }
 0x121   : > { %1541 = vmatpush3.bf16.msra.mxu1 %v1538_v23 }
 0x122   : > { %v644_v37 = vadd.f32 %v1283_v35, %v612_v32  ;;  %1410 = vmatprep.mubr.f32.mxu1 %v643_v34  ;;  %v876_v44 = vmul.f32 %v1283_v35, %v612_v32  ;;  %v1991_v32 = vld [vmem:[%s2076_s3] ss:$0 sm:$0xff] }
 0x124   : > { %v1284_v38 = vpop.f32.mrb[20].mxu0  ;;  %1411 = vmatmul.mubr.f32.gmra.mrb[8].mxu1 %v644_v37 }
 0x125   : > { %v1285_v39 = vpop.f32.mrb[21].mxu0 }
 0x126   : > { %v1286_v41 = vadd.f32 %v1285_v39, %v1284_v38  ;;  %v1287_v42 = vpop.f32.mrb[22].mxu0  ;;  %v2002_v39 = vld [vmem:[%s2078_s5] ss:$0 sm:$0xff] }
 0x127   : > { %v1288_v43 = vpop.f32.mrb[23].mxu0 }
 0x128   : > { %v645_v47 = vadd.f32 %v1286_v41, %v613_v40  ;;  %v1289_v48 = vadd.f32 %v1288_v43, %v1287_v42  ;;  %v877_v45 = vmul.f32 %v1286_v41, %v613_v40 }
 0x12a   : > { %v646_v50 = vadd.f32 %v1289_v48, %v614_v46  ;;  %1413 = vmatprep.mubr.f32.mxu1 %v645_v47  ;;  %v878_v49 = vmul.f32 %v1289_v48, %v614_v46 }
 0x12c   : > { %v1290_v51 = vpop.f32.mrb[24].mxu0  ;;  %1414 = vmatmul.mubr.f32.gmra.mrb[10].mxu1 %v646_v50 }
 0x12d   : > { %v1291_v52 = vpop.f32.mrb[25].mxu0 }
 0x12e   : > { %v1292_v55 = vadd.f32 %v1291_v52, %v1290_v51  ;;  %v1293_v56 = vpop.f32.mrb[26].mxu0 }
 0x12f   : > { %v1294_v57 = vpop.f32.mrb[27].mxu0 }
 0x130   : > { %v647_v59 = vadd.f32 %v1292_v55, %v615_v54  ;;  %v1295_v62 = vadd.f32 %v1294_v57, %v1293_v56  ;;  %v879_v53 = vmul.f32 %v1292_v55, %v615_v54 }
 0x132   : > { %v648_v63 = vadd.f32 %v1295_v62, %v616_v58  ;;  %1416 = vmatprep.mubr.f32.mxu1 %v647_v59  ;;  %v880_v60 = vmul.f32 %v1295_v62, %v616_v58 }
 0x134   : > { %v1296_v0 = vpop.f32.mrb[28].mxu0  ;;  %1417 = vmatmul.mubr.f32.gmra.mrb[12].mxu1 %v648_v63 }
 0x135   : > { %v1297_v2 = vpop.f32.mrb[29].mxu0 }
 0x136   : > { %v1298_v4 = vadd.f32 %v1297_v2, %v1296_v0  ;;  %v1299_v6 = vpop.f32.mrb[30].mxu0 }
 0x137   : > { %v1300_v7 = vpop.f32.mrb[31].mxu0 }
 0x138   : > { %v649_v9 = vadd.f32 %v1298_v4, %v617_v3  ;;  %v1301_v10 = vadd.f32 %v1300_v7, %v1299_v6  ;;  %v881_v61 = vmul.f32 %v1298_v4, %v617_v3 }
 0x13a   : > { %v650_v11 = vadd.f32 %v1301_v10, %v618_v8  ;;  %1419 = vmatprep.mubr.f32.mxu1 %v649_v9  ;;  %v882_v1 = vmul.f32 %v1301_v10, %v618_v8 }
 0x13c   : > { %1420 = vmatmul.mubr.f32.gmra.mrb[14].mxu1 %v650_v11 }
 0x13d   : > { %1454 = vmatprep.mubr.f32.mxu1 %v867_v14 }
 0x140   : > { %1455 = vmatmul.mubr.f32.vlgmr.msra.gmra.mrb[16].mxu1 %v868_v15 }
 0x141   : > { %1457 = vmatprep.mubr.f32.mxu1 %v869_v16 }
 0x144   : > { %1458 = vmatmul.mubr.f32.gmra.mrb[18].mxu1 %v870_v18 }
 0x145   : > { %1460 = vmatprep.mubr.f32.mxu1 %v871_v19 }
 0x148   : > { %1461 = vmatmul.mubr.f32.gmra.mrb[20].mxu1 %v872_v29 }
 0x149   : > { %1463 = vmatprep.mubr.f32.mxu1 %v873_v30 }
 0x14c   : > { %1464 = vmatmul.mubr.f32.gmra.mrb[22].mxu1 %v874_v33 }
 0x14d   : > { %1466 = vmatprep.mubr.f32.mxu1 %v875_v36 }
 0x150   : > { %1467 = vmatmul.mubr.f32.gmra.mrb[24].mxu1 %v876_v44 }
 0x151   : > { %1469 = vmatprep.mubr.f32.mxu1 %v877_v45 }
 0x154   : > { %1470 = vmatmul.mubr.f32.gmra.mrb[26].mxu1 %v878_v49 }
 0x155   : > { %1472 = vmatprep.mubr.f32.mxu1 %v879_v53 }
 0x158   : > { %1473 = vmatmul.mubr.f32.gmra.mrb[28].mxu1 %v880_v60 }
 0x159   : > { %1475 = vmatprep.mubr.f32.mxu1 %v881_v61 }
 0x15c   : > { %1476 = vmatmul.mubr.f32.gmra.mrb[30].mxu1 %v882_v1 }
 0x1d7   : > { %v1400_v5 = vpop.f32.mrb[0].mxu1 }
 0x1d8   : > { %v740_v12 = vpop.f32.mrb[1].mxu1  ;;  %v746_v35 = vadd.f32 %v1400_v5, %v1991_v32 }
 0x1d9   : > { %v741_v38 = vadd.f32 %v1991_v32, %v740_v12 }
 0x1da   : > { %v820_v41 = vmul.f32 0.01, %v746_v35 }
 0x1db   : > { %v819_v47 = vmul.f32 0.01, %v741_v38 }
 0x1dc   : > { %v836_v57 = vmax.f32 %v746_v35, %v820_v41 }
 0x1dd   : > { %v835_v0 = vmax.f32 %v741_v38, %v819_v47 }
 0x1df   : > { %v1403_v13 = vpop.f32.mrb[2].mxu1 }
 0x1e0   : > { %v750_v17 = vpop.f32.mrb[3].mxu1  ;;  %v756_v42 = vadd.f32 %v1403_v13, %v1991_v32 }
 0x1e1   : > { %v751_v48 = vadd.f32 %v1991_v32, %v750_v17 }
 0x1e2   : > { %v822_v58 = vmul.f32 0.01, %v756_v42 }
 0x1e3   : > { %v821_v2 = vmul.f32 0.01, %v751_v48 }
 0x1e4   : > { %v838_v15 = vmax.f32 %v756_v42, %v822_v58 }
 0x1e5   : > { %v837_v30 = vmax.f32 %v751_v48, %v821_v2 }
 0x1e7   : > { %v1406_v20 = vpop.f32.mrb[4].mxu1 }
 0x1e8   : > { %v760_v21 = vpop.f32.mrb[5].mxu1  ;;  %v766_v51 = vadd.f32 %v1406_v20, %v1991_v32 }
 0x1e9   : > { %v761_v54 = vadd.f32 %v1991_v32, %v760_v21 }
 0x1ea   : > { %v824_v6 = vmul.f32 0.01, %v766_v51 }
 0x1eb   : > { %v823_v9 = vmul.f32 0.01, %v761_v54 }
 0x1ec   : > { %v840_v53 = vmax.f32 %v766_v51, %v824_v6 }
 0x1ed   : > { %v839_v60 = vmax.f32 %v761_v54, %v823_v9 }
 0x1ef   : > { %v1409_v22 = vpop.f32.mrb[6].mxu1 }
 0x1f0   : > { %v770_v23 = vpop.f32.mrb[7].mxu1  ;;  %v776_v16 = vadd.f32 %v1409_v22, %v1991_v32 }
 0x1f1   : > { %v771_v33 = vadd.f32 %v1991_v32, %v770_v23 }
 0x1f2   : > { %v826_v12 = vmul.f32 0.01, %v776_v16 }
 0x1f3   : > { %v825_v22 = vmul.f32 0.01, %v771_v33 }
 0x1f4   : > { %v842_v48 = vmax.f32 %v776_v16, %v826_v12 }
 0x1f5   : > { %v841_v54 = vmax.f32 %v771_v33, %v825_v22 }
 0x1f7   : > { %v1412_v24 = vpop.f32.mrb[8].mxu1 }
 0x1f8   : > { %v1978_v25 = vpop.f32.mrb[9].mxu1  ;;  %v786_v13 = vadd.f32 %v1412_v24, %v1991_v32 }
 0x1f9   : > { %v781_v23 = vadd.f32 %v1991_v32, %v1978_v25 }
 0x1ff   : > { %v1980_v26 = vpop.f32.mrb[10].mxu1 }
 0x200   : > { %v1982_v27 = vpop.f32.mrb[11].mxu1 }
 0x201   : > { %v791_v42 = vadd.f32 %v1991_v32, %v1982_v27 }
 0x207   : > { %v1984_v28 = vpop.f32.mrb[12].mxu1 }
 0x208   : > { %v1986_v31 = vpop.f32.mrb[13].mxu1 }
 0x209   : > { %v801_v9 = vadd.f32 %v1991_v32, %v1986_v31 }
 0x20f   : > { %v1993_v34 = vpop.f32.mrb[14].mxu1 }
 0x210   : > { %v1996_v37 = vpop.f32.mrb[15].mxu1  ;;  %v816_v33 = vadd.f32 %v1993_v34, %v1991_v32 }
 0x213   : > { %v1456_v40 = vpop.f32.mrb[16].mxu1 }
 0x214   : > { %v978_v43 = vadd.f32 %v1456_v40, %v2002_v39  ;;  %v972_v46 = vpop.f32.mrb[17].mxu1  ;;  %v796_v40 = vadd.f32 %v1980_v26, %v1991_v32 }
 0x215   : > { %v973_v50 = vadd.f32 %v2002_v39, %v972_v46 }
 0x216   : > { %v1068_v52 = vmul.f32 0.01, %v978_v43 }
 0x217   : > { %v1067_v55 = vmul.f32 0.01, %v973_v50  ;;  %v1459_v56 = vpop.f32.mrb[18].mxu1 }
 0x218   : > { %v1084_v59 = vmax.f32 %v978_v43, %v1068_v52  ;;  %v988_v62 = vadd.f32 %v1459_v56, %v2002_v39  ;;  %v982_v63 = vpop.f32.mrb[19].mxu1 }
 0x219   : > { %v1083_v3 = vmax.f32 %v973_v50, %v1067_v55  ;;  %v983_v4 = vadd.f32 %v2002_v39, %v982_v63  ;;  %v828_v50 = vmul.f32 0.01, %v786_v13  ;;  %v827_v55 = vmul.f32 0.01, %v781_v23 }
 0x21a   : > { %v1100_v7 = vadd.f32 %v1084_v59, %v836_v57  ;;  %v1070_v8 = vmul.f32 0.01, %v988_v62  ;;  %v830_v57 = vmul.f32 0.01, %v796_v40  ;;  %v829_v59 = vmul.f32 0.01, %v791_v42 }
 0x21b   : > { %v1099_v10 = vadd.f32 %v1083_v3, %v835_v0  ;;  %v1069_v11 = vmul.f32 0.01, %v983_v4  ;;  %v1462_v14 = vpop.f32.mrb[20].mxu1  ;;  %v844_v2 = vmax.f32 %v786_v13, %v828_v50  ;;  %v806_v3 = vadd.f32 %v1984_v28, %v1991_v32 }
 0x21c   : > { %1116 = vst [vmem:[%s2016_s18 + $0x8] sm:$0xff] %v1100_v7  ;;  %v1086_v18 = vmax.f32 %v988_v62, %v1070_v8  ;;  %v998_v19 = vadd.f32 %v1462_v14, %v2002_v39  ;;  %v992_v29 = vpop.f32.mrb[21].mxu1  ;;  %v843_v8 = vmax.f32 %v781_v23, %v827_v55  ;;  %v846_v16 = vmax.f32 %v796_v40, %v830_v57 }
 0x21d   : > { %1115 = vst [vmem:[%s2016_s18] sm:$0xff] %v1099_v10  ;;  %v1085_v36 = vmax.f32 %v983_v4, %v1069_v11  ;;  %v993_v44 = vadd.f32 %v2002_v39, %v992_v29 }
 0x21e   : > { %v1102_v45 = vadd.f32 %v1086_v18, %v838_v15  ;;  %v1072_v49 = vmul.f32 0.01, %v998_v19  ;;  %v845_v18 = vmax.f32 %v791_v42, %v829_v59 }
 0x21f   : > { %v1101_v61 = vadd.f32 %v1085_v36, %v837_v30  ;;  %v1071_v1 = vmul.f32 0.01, %v993_v44  ;;  %v1465_v5 = vpop.f32.mrb[22].mxu1  ;;  %v832_v30 = vmul.f32 0.01, %v806_v3 }
 0x220   : > { %1118 = vst [vmem:[%s2016_s18 + $0x18] sm:$0xff] %v1102_v45  ;;  %v1088_v17 = vmax.f32 %v998_v19, %v1072_v49  ;;  %v1008_v20 = vadd.f32 %v1465_v5, %v2002_v39  ;;  %v1002_v21 = vpop.f32.mrb[23].mxu1  ;;  %v831_v45 = vmul.f32 0.01, %v801_v9  ;;  %v811_v49 = vadd.f32 %v1991_v32, %v1996_v37 }
 0x221   : > { %1117 = vst [vmem:[%s2016_s18 + $0x10] sm:$0xff] %v1101_v61  ;;  %v1087_v35 = vmax.f32 %v993_v44, %v1071_v1  ;;  %v1003_v38 = vadd.f32 %v2002_v39, %v1002_v21  ;;  %v848_v13 = vmax.f32 %v806_v3, %v832_v30 }
 0x222   : > { %v1104_v41 = vadd.f32 %v1088_v17, %v840_v53  ;;  %v1074_v24 = vmul.f32 0.01, %v1008_v20  ;;  %v834_v17 = vmul.f32 0.01, %v816_v33  ;;  %v847_v32 = vmax.f32 %v801_v9, %v831_v45 }
 0x223   : > { %v1103_v43 = vadd.f32 %v1087_v35, %v839_v60  ;;  %v1073_v46 = vmul.f32 0.01, %v1003_v38  ;;  %v1468_v47 = vpop.f32.mrb[24].mxu1  ;;  %v833_v37 = vmul.f32 0.01, %v811_v49 }
 0x224   : > { %1120 = vst [vmem:[%s2016_s18 + $0x28] sm:$0xff] %v1104_v41  ;;  %v1090_v25 = vmax.f32 %v1008_v20, %v1074_v24  ;;  %v1018_v51 = vadd.f32 %v1468_v47, %v2002_v39  ;;  %v1012_v52 = vpop.f32.mrb[25].mxu1  ;;  %v850_v42 = vmax.f32 %v816_v33, %v834_v17 }
 0x225   : > { %1119 = vst [vmem:[%s2016_s18 + $0x20] sm:$0xff] %v1103_v43  ;;  %v1089_v26 = vmax.f32 %v1003_v38, %v1073_v46  ;;  %v1013_v56 = vadd.f32 %v2002_v39, %v1012_v52  ;;  %v849_v46 = vmax.f32 %v811_v49, %v833_v37 }
 0x226   : > { %v1106_v27 = vadd.f32 %v1090_v25, %v842_v48  ;;  %v1076_v58 = vmul.f32 0.01, %v1018_v51 }
 0x227   : > { %v1105_v62 = vadd.f32 %v1089_v26, %v841_v54  ;;  %v1075_v63 = vmul.f32 0.01, %v1013_v56  ;;  %v1471_v0 = vpop.f32.mrb[26].mxu1 }
 0x228   : > { %1122 = vst [vmem:[%s2016_s18 + $0x38] sm:$0xff] %v1106_v27  ;;  %v1092_v4 = vmax.f32 %v1018_v51, %v1076_v58  ;;  %v1028_v6 = vadd.f32 %v1471_v0, %v2002_v39  ;;  %v1022_v7 = vpop.f32.mrb[27].mxu1 }
 0x229   : > { %1121 = vst [vmem:[%s2016_s18 + $0x30] sm:$0xff] %v1105_v62  ;;  %v1091_v10 = vmax.f32 %v1013_v56, %v1075_v63  ;;  %v1023_v11 = vadd.f32 %v2002_v39, %v1022_v7 }
 0x22a   : > { %v1108_v14 = vadd.f32 %v1092_v4, %v844_v2  ;;  %v1078_v15 = vmul.f32 0.01, %v1028_v6 }
 0x22b   : > { %v1107_v28 = vadd.f32 %v1091_v10, %v843_v8  ;;  %v1077_v19 = vmul.f32 0.01, %v1023_v11  ;;  %v1474_v29 = vpop.f32.mrb[28].mxu1 }
 0x22c   : > { %1124 = vst [vmem:[%s2016_s18 + $0x48] sm:$0xff] %v1108_v14  ;;  %v1094_v36 = vmax.f32 %v1028_v6, %v1078_v15  ;;  %v1038_v31 = vadd.f32 %v1474_v29, %v2002_v39  ;;  %v1032_v44 = vpop.f32.mrb[29].mxu1 }
 0x22d   : > { %1123 = vst [vmem:[%s2016_s18 + $0x40] sm:$0xff] %v1107_v28  ;;  %v1093_v53 = vmax.f32 %v1023_v11, %v1077_v19  ;;  %v1033_v60 = vadd.f32 %v2002_v39, %v1032_v44 }
 0x22e   : > { %v1110_v61 = vadd.f32 %v1094_v36, %v846_v16  ;;  %v1080_v1 = vmul.f32 0.01, %v1038_v31 }
 0x22f   : > { %v1109_v5 = vadd.f32 %v1093_v53, %v845_v18  ;;  %v1079_v12 = vmul.f32 0.01, %v1033_v60  ;;  %v1477_v34 = vpop.f32.mrb[30].mxu1 }
 0x230   : > { %1126 = vst [vmem:[%s2016_s18 + $0x58] sm:$0xff] %v1110_v61  ;;  %v1096_v20 = vmax.f32 %v1038_v31, %v1080_v1  ;;  %v1048_v21 = vadd.f32 %v1477_v34, %v2002_v39  ;;  %v1042_v22 = vpop.f32.mrb[31].mxu1 }
 0x231   : > { %1125 = vst [vmem:[%s2016_s18 + $0x50] sm:$0xff] %v1109_v5  ;;  %v1095_v23 = vmax.f32 %v1033_v60, %v1079_v12  ;;  %v1043_v35 = vadd.f32 %v2002_v39, %v1042_v22 }
 0x232   : > { %v1112_v38 = vadd.f32 %v1096_v20, %v848_v13  ;;  %v1082_v40 = vmul.f32 0.01, %v1048_v21 }
 0x233   : > { %v1111_v41 = vadd.f32 %v1095_v23, %v847_v32  ;;  %v1081_v24 = vmul.f32 0.01, %v1043_v35 }
 0x234   : > { %1128 = vst [vmem:[%s2016_s18 + $0x68] sm:$0xff] %v1112_v38  ;;  %v1098_v43 = vmax.f32 %v1048_v21, %v1082_v40 }
 0x235   : > { %1127 = vst [vmem:[%s2016_s18 + $0x60] sm:$0xff] %v1111_v41  ;;  %v1097_v47 = vmax.f32 %v1043_v35, %v1081_v24 }
 0x236   : > { %v1114_v48 = vadd.f32 %v1098_v43, %v850_v42 }
 0x237   : > { %v1113_v50 = vadd.f32 %v1097_v47, %v849_v46 }
 0x238   : > { %1130 = vst [vmem:[%s2016_s18 + $0x78] sm:$0xff] %v1114_v48 }
 0x239   : > { %1129 = vst [vmem:[%s2016_s18 + $0x70] sm:$0xff] %v1113_v50 }
 0x23a PF: > { %s16_s23 = sadd.s32 1, %s1612_s23   ;;  %s2080_s21 = smov %s1608_s22 }
 0x23b   : > { %p13_p5 = scmp.ge.s32.totalorder %s16_s23, 4   ;;  %s2081_s22 = smov %s2083_s24 }
 0x23d   :  { %15 = sbr.rel (!%p13_p5) target bundleno = 2 (0x2), region = 84 }

</bundles_post_ra>
